<compile_context>
chip_gen: v7x
topology: tpu7x:2x2x1
jax: 0.10.0
libtpu: 0.0.40
codegen_flags: <defaults>
</compile_context>

<pallas_src>
import functools

import jax
import jax.numpy as jnp
from jax.experimental import pallas as pl
from jax.experimental.pallas import tpu as pltpu


# --------------------------------------------------------------------------
# Kernel
# --------------------------------------------------------------------------
def _ce_partial_kernel(score_ref, ans_ref, out_ref, *, batch):
    """Partial answer-normalized listwise CE sum for one batch tile.

    score_ref, ans_ref : (TM, N) in native dtype (VMEM); cast to f32 on load.
    out_ref            : (1, 8, 128) f32 (VMEM); the block's partial sum is
                         replicated over the slab (wrapper reads [:, 0, 0]).
    """
    tm = score_ref.shape[0]
    i = pl.program_id(0)

    s = score_ref[...].astype(jnp.float32)                       # (TM, N)
    a = ans_ref[...].astype(jnp.float32)                         # (TM, N)

    # numerically-stable log-sum-exp over passages (lane axis)
    m = jnp.max(s, axis=-1, keepdims=True)                       # (TM, 1)
    z = s - m                                                    # z <= 0
    lse = jnp.log(jnp.sum(jnp.exp(z), axis=-1, keepdims=True))   # lse >= 0

    # -sum_p a_p * log_softmax(s)_p == sum_p a_p * (lse - z_p); every term >= 0
    sum_a = jnp.sum(a, axis=-1, keepdims=True)                   # (TM, 1)
    ce = jnp.sum(a * (lse - z), axis=-1, keepdims=True)          # (TM, 1)
    per_example = ce / jnp.maximum(sum_a, 1.0)                   # guard empty rows

    # mask rows of the (possibly padded) last block
    row = jax.lax.broadcasted_iota(jnp.int32, (tm, 1), 0) + i * tm
    partial = jnp.sum(jnp.where(row < batch, per_example, 0.0))

    out_ref[...] = jnp.broadcast_to(partial, out_ref.shape)


# --------------------------------------------------------------------------
# Per-chip sizing helpers
# --------------------------------------------------------------------------
def _round_up(x, m):
    return ((x + m - 1) // m) * m


def _vmem_budget_bytes():
    """~75% of physical VMEM (96 MiB on v5e/v6e, 48 MiB on v7x), safe fallback."""
    try:
        cap = int(pltpu.get_tpu_info().vmem_capacity_bytes)
    except Exception:
        cap = 64 << 20                      # conservative (v7x per-TC) fallback
    return min(int(cap * 0.75), 112 << 20)


def _num_tensorcores():
    """Best-effort TensorCore count per chip (2 on v7x, else 1)."""
    try:
        dev = jax.devices()[0]
        kind = (getattr(dev, "device_kind", "") or "").lower()
        if "v7" in kind:
            return 2
        nc = getattr(dev, "num_cores", None)
        if nc:
            return int(nc)
    except Exception:
        pass
    return 1


def _choose_row_tile(batch, n, itemsize_score, itemsize_ans, vmem_budget, num_tc):
    """Row tile sized from native-dtype HBM bytes + f32 working set, 32-aligned."""
    # Per grid step: 2 pipeline buffers per input (native dtype) plus roughly
    # three f32-sized elementwise intermediates materialized by the compiler.
    per_row = 2 * n * (itemsize_score + itemsize_ans) + 12 * n
    tm = int(vmem_budget * 0.7) // max(per_row, 1)
    tm = max(32, (tm // 32) * 32)
    if num_tc > 1 and batch >= 64:
        # Guarantee >= 2 blocks so the "parallel" axis shards across TensorCores.
        tm = min(tm, _round_up(pl.cdiv(batch, num_tc), 32))
    if batch <= tm:
        return batch          # single full-batch block (full-dim rows always legal)
    return tm


# --------------------------------------------------------------------------
# Wrapper
# --------------------------------------------------------------------------
def fusion_general_retr_bnn_loss(batch_score, batch_answers,
                                 log_variational_posterior, log_prior,
                                 row_tile=None):
    """Mirrors FusionGeneralRetrBNNLoss.forward (scalar loss)."""
    B, N = batch_score.shape
    is_s = jnp.dtype(batch_score.dtype).itemsize
    is_a = jnp.dtype(batch_answers.dtype).itemsize

    vmem_budget = _vmem_budget_bytes()
    num_tc = _num_tensorcores()

    if row_tile is not None:
        tm = B if row_tile >= B else row_tile
    else:
        tm = _choose_row_tile(B, N, is_s, is_a, vmem_budget, num_tc)
    nblk = pl.cdiv(B, tm)

    cost = pl.CostEstimate(
        flops=8 * B * N,
        transcendentals=B * N + B,
        bytes_accessed=B * N * (is_s + is_a) + nblk * 8 * 128 * 4,
    )

    partials = pl.pallas_call(
        functools.partial(_ce_partial_kernel, batch=B),
        out_shape=jax.ShapeDtypeStruct((nblk, 8, 128), jnp.float32),
        grid=(nblk,),
        in_specs=[
            pl.BlockSpec((tm, N), lambda i: (i, 0)),     # scores  (native dtype)
            pl.BlockSpec((tm, N), lambda i: (i, 0)),     # answers (native dtype)
        ],
        out_specs=pl.BlockSpec((1, 8, 128), lambda i: (i, 0, 0)),
        compiler_params=pltpu.CompilerParams(
            dimension_semantics=("parallel",),           # megacore-shard the batch axis
            vmem_limit_bytes=vmem_budget,
        ),
        cost_estimate=cost,
    )(batch_score, batch_answers)

    # Tiny final reduction + Bayesian complexity term in plain JAX.
    mle_loss = jnp.sum(partials[:, 0, 0]) / B
    complex_loss = (jnp.asarray(log_variational_posterior, jnp.float32)
                    - jnp.asarray(log_prior, jnp.float32)) / B
    return complex_loss + mle_loss


# --------------------------------------------------------------------------
# Pure-JAX reference for correctness checking
# --------------------------------------------------------------------------
def _reference(batch_score, batch_answers, lvp, lp):
    s = batch_score.astype(jnp.float32)
    a = batch_answers.astype(jnp.float32)
    log_p = jax.nn.log_softmax(s, axis=-1)
    denom = jnp.maximum(jnp.sum(a, axis=-1), 1.0)
    per_example = -jnp.sum(a * log_p, axis=-1) / denom
    mle = jnp.mean(per_example)
    complex_loss = (jnp.asarray(lvp, jnp.float32)
                    - jnp.asarray(lp, jnp.float32)) / s.shape[0]
    return complex_loss + mle


if __name__ == "__main__":
    key = jax.random.PRNGKey(0)
    (k_s1, k_a1, k_lvp, k_lp, k_s2, k_a2, k_s3, k_a3) = jax.random.split(key, 8)

    log_variational_posterior = jax.random.normal(k_lvp, ()) * 10.0 + 50.0
    log_prior = jax.random.normal(k_lp, ()) * 10.0 + 20.0

    # --- test 1: small case, bf16 scores + int8 answers streamed natively ---
    B1, N1 = 4, 128
    score1 = jax.random.normal(k_s1, (B1, N1), dtype=jnp.float32).astype(jnp.bfloat16)
    ans1 = (jax.random.uniform(k_a1, (B1, N1)) < 0.1).astype(jnp.int8)
    ans1 = ans1.at[:, 0].set(1)

    loss1 = fusion_general_retr_bnn_loss(score1, ans1,
                                         log_variational_posterior, log_prior)
    loss1 = jax.block_until_ready(loss1)
    ref1 = _reference(score1, ans1, log_variational_posterior, log_prior)
    assert jnp.allclose(loss1, ref1, rtol=1e-4, atol=1e-4), (loss1, ref1)

    # --- test 2: f32 inputs, multi-block grid with padded/masked last tile ---
    B2, N2 = 20, 256
    score2 = jax.random.normal(k_s2, (B2, N2), dtype=jnp.float32)
    ans2 = (jax.random.uniform(k_a2, (B2, N2)) < 0.05).astype(jnp.float32)
    ans2 = ans2.at[:, 0].set(1.0)

    loss2 = fusion_general_retr_bnn_loss(score2, ans2,
                                         log_variational_posterior, log_prior,
                                         row_tile=8)
    loss2 = jax.block_until_ready(loss2)
    ref2 = _reference(score2, ans2, log_variational_posterior, log_prior)
    assert jnp.allclose(loss2, ref2, rtol=1e-5, atol=1e-5), (loss2, ref2)

    # --- test 3: narrow dtypes, multi-block, B % tm != 0, N not mult. of 128 ---
    B3, N3 = 100, 200
    score3 = jax.random.normal(k_s3, (B3, N3), dtype=jnp.float32).astype(jnp.bfloat16)
    ans3 = (jax.random.uniform(k_a3, (B3, N3)) < 0.05).astype(jnp.int8)
    ans3 = ans3.at[:, 0].set(1)

    loss3 = fusion_general_retr_bnn_loss(score3, ans3,
                                         log_variational_posterior, log_prior,
                                         row_tile=32)
    loss3 = jax.block_until_ready(loss3)
    ref3 = _reference(score3, ans3, log_variational_posterior, log_prior)
    assert jnp.allclose(loss3, ref3, rtol=1e-4, atol=1e-4), (loss3, ref3)

    print("KERNEL_OK")
</pallas_src>

<mosaic_0001>
module attributes {stable_mosaic.version = 11 : i64} {
  func.func @_ce_partial_kernel(%arg0: i32, %arg1: memref<4x128xbf16, #tpu.memory_space<vmem>>, %arg2: memref<4x128xi8, #tpu.memory_space<vmem>>, %arg3: memref<1x8x128xf32, #tpu.memory_space<vmem>>) attributes {dimension_semantics = [#tpu.dimension_semantics<parallel>], iteration_bounds = array<i64: 1>, scalar_prefetch = 0 : i64, scratch_operands = 0 : i64, tpu.core_type = #tpu.core_type<tc>, window_params = [{transform_indices = @transform_0, window_bounds = array<i64: 4, 128>}, {transform_indices = @transform_1, window_bounds = array<i64: 4, 128>}, {transform_indices = @transform_2, window_bounds = array<i64: 1, 8, 128>}]} {
    %c0 = arith.constant 0 : index
    %c0_0 = arith.constant 0 : index
    %0 = vector.load %arg1[%c0, %c0_0] : memref<4x128xbf16, #tpu.memory_space<vmem>>, vector<4x128xbf16>
    %1 = arith.extf %0 : vector<4x128xbf16> to vector<4x128xf32>
    %c0_1 = arith.constant 0 : index
    %c0_2 = arith.constant 0 : index
    %2 = vector.load %arg2[%c0_1, %c0_2] : memref<4x128xi8, #tpu.memory_space<vmem>>, vector<4x128xi8>
    %3 = arith.sitofp %2 : vector<4x128xi8> to vector<4x128xf32>
    %cst = arith.constant dense<0xFF800000> : vector<4xf32>
    %4 = vector.multi_reduction <maximumf>, %1, %cst [1] : vector<4x128xf32> to vector<4xf32>
    %5 = vector.shape_cast %4 : vector<4xf32> to vector<4x1xf32>
    %6 = vector.broadcast %5 : vector<4x1xf32> to vector<4x128xf32>
    %7 = arith.subf %1, %6 : vector<4x128xf32>
    %8 = math.exp %7 : vector<4x128xf32>
    %cst_3 = arith.constant dense<0.000000e+00> : vector<4xf32>
    %9 = vector.multi_reduction <add>, %8, %cst_3 [1] : vector<4x128xf32> to vector<4xf32>
    %10 = vector.shape_cast %9 : vector<4xf32> to vector<4x1xf32>
    %11 = math.log %10 : vector<4x1xf32>
    %cst_4 = arith.constant dense<0.000000e+00> : vector<4xf32>
    %12 = vector.multi_reduction <add>, %3, %cst_4 [1] : vector<4x128xf32> to vector<4xf32>
    %13 = vector.shape_cast %12 : vector<4xf32> to vector<4x1xf32>
    %14 = vector.broadcast %11 : vector<4x1xf32> to vector<4x128xf32>
    %15 = arith.subf %14, %7 : vector<4x128xf32>
    %16 = arith.mulf %3, %15 : vector<4x128xf32>
    %cst_5 = arith.constant dense<0.000000e+00> : vector<4xf32>
    %17 = vector.multi_reduction <add>, %16, %cst_5 [1] : vector<4x128xf32> to vector<4xf32>
    %18 = vector.shape_cast %17 : vector<4xf32> to vector<4x1xf32>
    %cst_6 = arith.constant 1.000000e+00 : f32
    %19 = vector.broadcast %cst_6 : f32 to vector<4x1xf32>
    %20 = arith.maximumf %13, %19 : vector<4x1xf32>
    %21 = arith.divf %18, %20 : vector<4x1xf32>
    %22 = tpu.iota {dimensions = array<i32: 0>} : vector<4x1xi32>
    %c4_i32 = arith.constant 4 : i32
    %23 = arith.muli %arg0, %c4_i32 : i32
    %24 = vector.broadcast %23 : i32 to vector<4x1xi32>
    %25 = arith.addi %22, %24 : vector<4x1xi32>
    %c4_i32_7 = arith.constant 4 : i32
    %26 = vector.broadcast %c4_i32_7 : i32 to vector<4x1xi32>
    %27 = arith.cmpi slt, %25, %26 : vector<4x1xi32>
    %cst_8 = arith.constant 0.000000e+00 : f32
    %28 = vector.broadcast %cst_8 : f32 to vector<4x1xf32>
    %29 = arith.select %27, %21, %28 : vector<4x1xi1>, vector<4x1xf32>
    %30 = vector.shape_cast %29 : vector<4x1xf32> to vector<1x4x1xf32>
    %cst_9 = arith.constant dense<0.000000e+00> : vector<1xf32>
    %31 = vector.multi_reduction <add>, %30, %cst_9 [1, 2] : vector<1x4x1xf32> to vector<1xf32>
    %32 = vector.shape_cast %31 : vector<1xf32> to vector<1x1x1xf32>
    %33 = vector.extract %32[0, 0, 0] : f32 from vector<1x1x1xf32>
    %34 = vector.broadcast %33 : f32 to vector<1x8x128xf32>
    %c0_10 = arith.constant 0 : index
    %c0_11 = arith.constant 0 : index
    %c0_12 = arith.constant 0 : index
    %35 = vector.load %arg3[%c0_10, %c0_11, %c0_12] : memref<1x8x128xf32, #tpu.memory_space<vmem>>, vector<1x8x128xf32>
    tpu.vector_store %arg3[%c0_10, %c0_11, %c0_12], %34 {strides = array<i32>} : memref<1x8x128xf32, #tpu.memory_space<vmem>>, vector<1x8x128xf32>,
    return
  }
  func.func @transform_0(%arg0: i32) -> (i32, i32) {
    %c0_i32 = arith.constant 0 : i32
    %c0_i32_0 = arith.constant 0 : i32
    return %arg0, %c0_i32 : i32, i32
  }
  func.func @transform_1(%arg0: i32) -> (i32, i32) {
    %c0_i32 = arith.constant 0 : i32
    %c0_i32_0 = arith.constant 0 : i32
    return %arg0, %c0_i32 : i32, i32
  }
  func.func @transform_2(%arg0: i32) -> (i32, i32, i32) {
    %c0_i32 = arith.constant 0 : i32
    %c0_i32_0 = arith.constant 0 : i32
    %c0_i32_1 = arith.constant 0 : i32
    return %arg0, %c0_i32, %c0_i32_0 : i32, i32, i32
  }
}

</mosaic_0001>

<bundles_post_ra>
// kernel: tpu_custom_call.1
= control target key start
LH: loop header
LB: loop body
LE: loop exit
PB: predicated region body
PF: predicated region fallthrough
CT: control target
= control target key end

     0   :  { %7 = vsyncpa [#allocation3], 0  ;;  %s193_s0 = inlined_call_operand.hbm [shape: bf16[4,128], index: 0, kind: input, shape index: {}]   ;;  %s194_s1 = inlined_call_operand.vmem [shape: s8[4,128], index: 1, kind: input, shape index: {}]   ;;  %s195_s2 = inlined_call_operand.hbm [shape: f32[1,8,128], index: 2, kind: output, shape index: {}]  }
   0x1   :  { %8 = vsyncpa [#allocation4], 0  ;;  %s145_s9 = smov [#allocation2]   ;;  %s97_s13 = scalar_lea.hbm %s193_s0, 32 }
   0x2   :  { %s15_s10 = sshll.u32 %s145_s9, 4  ;;  %p98_p0 = scmp.ne.s32.totalorder %s193_s0, %s97_s13  ;;  %s16_s10 = int_to_ptr.vmem [resolvable:$true] %s15_s10 }
   0x3   :  { %p101_p1 = scmp.lt.u32.totalorder %s97_s13, %s193_s0 }
   0x5   :  { %p103_p2 = pnand %p101_p1, %p98_p0 }
   0x7   :  { %106 = shalt.err (!%p103_p2)
}
   0x8   :  { %s107_s18 = scalar_lea.vmem %s16_s10, 32  ;;  %p112_p4 = scmp.lt.s32.totalorder %s16_s10, %s16_s10 }
   0x9   :  { %p108_p3 = scmp.ne.s32.totalorder %s16_s10, %s107_s18  ;;  %p113_p5 = scmp.lt.s32.totalorder %s107_s18, %s107_s18 }
   0xb   :  { %p114_p6 = por %p113_p5, %p112_p4 }
   0xd   :  { %p115_p7 = pnand %p114_p6, %p108_p3 }
   0xf   :  { %118 = shalt.err (!%p115_p7)
}
  0x10   :  { %18 = dma.hbm_to_vmem [thread:$0]  %s193_s0, 32, %s16_s10, [#allocation3]  }
  0x11   :  { %141 = dma.done.wait [#allocation3], 32  }
  0x12   :  { %142 = vsyncadd [#allocation3], 4294967264  ;;  %v24_v0 = vld [vmem:[#allocation2] sm:$0x3]  ;;  %vm29_vm0 = vcmask 1043456   ;;  %v52_v20 = vlaneseq  ;;  %vm59_vm2 = vcmask 3072  }
  0x13   :  { %v25_v1 = vunpack.c.l.bf16 %v24_v0  ;;  %v26_v8 = vld [vmem:[%s194_s1] sm:$0x1]  ;;  %s146_s0 = smov [#allocation5]  }
  0x14   :  { %v27_v9 = vunpack.c.0.s8 %v26_v8  ;;  %v53_v21 = vshrl.u32 %v52_v20, 7  ;;  %s78_s1 = sshll.u32 %s146_s0, 4  ;;  %s79_s1 = int_to_ptr.vmem [resolvable:$true] %s78_s1 }
  0x15   :  { %v30_v2 = vsel %vm29_vm0, %v25_v1, -inf  ;;  %s119_s24 = scalar_lea.vmem %s79_s1, 128  ;;  %p124_p9 = scmp.lt.s32.totalorder %s79_s1, %s79_s1 }
  0x16   :  { %31 = vmax.xlane.f32.xlu0 %v30_v2  ;;  %v28_v10 = vcvt.s32.f32 %v27_v9  ;;  %vm57_vm1 = vcmp.lt.s32.totalorder %v53_v21, 4  ;;  %p120_p8 = scmp.ne.s32.totalorder %s79_s1, %s119_s24  ;;  %p125_p10 = scmp.lt.s32.totalorder %s119_s24, %s119_s24 }
  0x18   :  { %v41_v11 = vsel %vm29_vm0, %v28_v10, 0.0  ;;  %p126_p11 = por %p125_p10, %p124_p9 }
  0x19   :  { %42 = vadd.xlane.f32.xlu1 %v41_v11 }
  0x1a   :  { %p127_p12 = pnand %p126_p11, %p120_p8 }
  0xa3   :  { %v32_v3 = vpop.xlane.xlu0 %31 }
  0xa4   :  { %v33_v4 = vsub.f32 %v25_v1, %v32_v3 }
  0xa6   :  { %v34_v5 = vmul.f32 1.442695, %v33_v4  ;;  %v43_v18 = vpop.xlane.xlu1 %42 }
  0xa7   :  { %v49_v19 = vmax.f32 %v43_v18, 1.0 }
  0xa8   :  { %91 = vpow2.f32 %v34_v5 }
  0xb2   :  { %v92_v6 = vpop.eup %91 }
  0xb3   :  { %v36_v7 = vsel %vm29_vm0, %v92_v6, 0.0 }
  0xb4   :  { %37 = vadd.xlane.f32.xlu0 %v36_v7 }
 0x141   :  { %v38_v12 = vpop.xlane.xlu0 %37 }
 0x142   :  { %93 = vlog2.f32 %v38_v12 }
 0x143   :  { %95 = vrcp.f32 %v49_v19 }
 0x14c   :  { %v94_v13 = vpop.eup %93 }
 0x14d   :  { %v40_v14 = vmul.f32 0.6931472, %v94_v13  ;;  %v96_v22 = vpop.eup %95 }
 0x14f   :  { %v44_v15 = vsub.f32 %v40_v14, %v33_v4 }
 0x151   :  { %v45_v16 = vmul.f32 %v44_v15, %v28_v10 }
 0x153   :  { %v46_v17 = vsel %vm29_vm0, %v45_v16, 0.0 }
 0x154   :  { %47 = vadd.xlane.f32.xlu1 %v46_v17 }
 0x1e1   :  { %v48_v23 = vpop.xlane.xlu1 %47 }
 0x1e2   :  { %v51_v24 = vmul.f32 %v96_v22, %v48_v23 }
 0x1e4   :  { %v58_v25 = vsel %vm57_vm1, %v51_v24, 0.0 }
 0x1e5   :  { %v60_v26 = vsel %vm59_vm2, %v58_v25, 0.0 }
 0x1e6   :  { %61 = vadd.xlane.f32.xlu0 %v60_v26 }
 0x273   :  { %v62_v27 = vpop.xlane.xlu0 %61 }
 0x274   :  { %v63_v28 = vrot.slane %v62_v27, 4 }
 0x276   :  { %v64_v29 = vadd.f32 %v63_v28, %v62_v27 }
 0x278   :  { %v65_v30 = vrot.slane %v64_v29, 2 }
 0x27a   :  { %v66_v31 = vadd.f32 %v65_v30, %v64_v29 }
 0x27c   :  { %v67_v32 = vrot.slane %v66_v31, 1 }
 0x27e   :  { %v68_v33 = vadd.f32 %v67_v32, %v66_v31 }
 0x280   :  { %87 = vpush %v68_v33 }
 0x2b1   :  { %s88_s23 = spop %87 }
 0x2b2   :  { %v70_v34 = vstv %s88_s23 }
 0x2b3   :  { %71 = vst [vmem:[#allocation5] sm:$0xff] %v70_v34 }
 0x2b4   :  { %130 = shalt.err (!%p127_p12)
}
 0x2b5   :  { %s131_s27 = scalar_lea.hbm %s195_s2, 128 }
 0x2b6   :  { %p132_p13 = scmp.ne.s32.totalorder %s195_s2, %s131_s27  ;;  %p135_p0 = scmp.lt.u32.totalorder %s131_s27, %s195_s2 }
 0x2b8   :  { %p137_p1 = pnand %p135_p0, %p132_p13 }
 0x2ba   :  { %140 = shalt.err (!%p137_p1)
}
 0x2bb   :  { %81 = dma.vmem_to_hbm [thread:$0]  %s79_s1, 128, %s195_s2, [#allocation4]  }
 0x2bc   :  { %143 = dma.done.wait [#allocation4], 128  }
 0x2bd   :  { %144 = vsyncadd [#allocation4], 4294967168 }
 0x2be   :  { %85 = vsyncpa [#allocation3], 1 }
 0x2bf   :  { %86 = vsyncpa [#allocation4], 1 }

</bundles_post_ra>
